<compile_context>
chip_gen: v5e
topology: v5e:2x2
jax: 0.10.0
libtpu: 0.0.40
codegen_flags: <defaults>
</compile_context>

<pallas_src>
import jax
import jax.numpy as jnp
from jax.experimental import pallas as pl
from jax.experimental.pallas import tpu as pltpu


GRAN = 1024          # 8 sublanes * 128 lanes: batch-tile granularity
MAX_TILE_B = 262144  # ~12.6 MiB of double-buffered f32 buffers — fits all gens


def _linear_kernel(w_ref, x_ref, o_ref):
    """w_ref: (K,) f32 in SMEM.  x_ref: (K, 8, C) in VMEM.  o_ref: (8, C).

    Unrolled K=5 VPU MAC: each (8, C) feature slab is scaled by its scalar
    weight and summed into one lane+sublane-dense output slab.  f32 accumulate,
    cast to the output dtype on store.  (Per review: leave this body alone —
    HBM bandwidth / grid-step overhead is the binding resource, not any slot.)
    """
    k_dim = x_ref.shape[0]
    acc = x_ref[0].astype(jnp.float32) * w_ref[0]
    for k in range(1, k_dim):                    # K=5, fully unrolled at trace
        acc = acc + x_ref[k].astype(jnp.float32) * w_ref[k]
    o_ref[...] = acc.astype(o_ref.dtype)


def linear_forward(x: jax.Array, weight: jax.Array, *,
                   tile_b: int = 131072,
                   x_is_feature_major: bool = False) -> jax.Array:
    """x: (B, in_features) [or (in_features, B) if x_is_feature_major],
    weight: (1, in_features).  Returns (B, 1), matching nn.Linear(5,1,bias=False)."""
    if x_is_feature_major:
        K, B = x.shape
    else:
        B, K = x.shape
    N, K2 = weight.shape
    assert K == K2 and N == 1, "kernel specialized to nn.Linear(5, 1, bias=False)"

    # ---- batch tiling (per-generation safe) ----------------------------------
    b_min = pl.cdiv(B, GRAN) * GRAN
    tile_req = max(GRAN, min(int(tile_b), MAX_TILE_B, b_min))
    tile_req = (tile_req // GRAN) * GRAN
    n_steps = pl.cdiv(b_min, tile_req)
    if n_steps == 1 and b_min >= 16 * GRAN:
        # Give the "parallel" grid axis >= 2 steps so v7x's 2 TCs both work.
        n_steps = 2
    tile_b = pl.cdiv(b_min // GRAN, n_steps) * GRAN   # per-step batch elements
    b_pad = n_steps * tile_b
    C = tile_b // 8                                   # lanes per output slab

    # ---- layout plumbing, fused into a single copy ---------------------------
    # (B, K) -> (K, B) transpose, pad only the lane (batch) axis; the 3-D
    # reshape below is a free dim-split (no data movement).
    # TODO(synk): best case is the producer emitting x feature-major so this
    # transpose copy disappears entirely (use x_is_feature_major=True).
    x_t = x if x_is_feature_major else x.T
    if b_pad != B:
        x_t = jnp.pad(x_t, ((0, 0), (0, b_pad - B)))
    x_t3 = x_t.reshape(K, 8 * n_steps, C)

    w_flat = weight.reshape(K).astype(jnp.float32)
    itemsize = jnp.dtype(x.dtype).itemsize

    out = pl.pallas_call(
        _linear_kernel,
        out_shape=jax.ShapeDtypeStruct((8 * n_steps, C), x.dtype),
        grid_spec=pl.GridSpec(
            grid=(n_steps,),
            in_specs=[
                # 5 weight scalars, whole array in SMEM (no VMEM tile wasted).
                pl.BlockSpec(memory_space=pltpu.MemorySpace.SMEM),
                # x tile: K feature slabs, each (8 sublanes, C lanes).
                pl.BlockSpec((K, 8, C), lambda i: (0, i, 0)),
            ],
            # Lane+sublane-dense output slab (full-vreg stores).
            out_specs=pl.BlockSpec((8, C), lambda i: (i, 0)),
        ),
        compiler_params=pltpu.CompilerParams(
            dimension_semantics=("parallel",),       # batch tiles independent
            vmem_limit_bytes=32 * 1024 * 1024,       # safe on v5e/v6e/v7x
        ),
        cost_estimate=pl.CostEstimate(
            flops=2 * B * K,
            transcendentals=0,
            bytes_accessed=B * K * itemsize + B * itemsize,
        ),
    )(w_flat, x_t3)

    # Back to the PyTorch (B, 1) convention (reshape is free; slice drops pad).
    return out.reshape(b_pad)[:B].reshape(B, N)


if __name__ == "__main__":
    key = jax.random.PRNGKey(0)
    IN, OUT = 5, 1

    # Deterministic parameter init: nn.init.ones_(self.linear.weight)
    weight = jnp.ones((OUT, IN), dtype=jnp.float32)

    # 1) Small batch consistent with the module (batch=8, in_features=5).
    x = jax.random.normal(key, (8, IN), dtype=jnp.float32)
    y = jax.block_until_ready(linear_forward(x, weight))
    ref = jnp.sum(x, axis=-1, keepdims=True)          # all-ones weight => row sum
    assert y.shape == (8, OUT)
    assert jnp.allclose(y, ref, atol=1e-5, rtol=1e-5)

    # 2) Non-aligned batch with multiple grid tiles (padding + parallel grid).
    x2 = jax.random.normal(jax.random.PRNGKey(1), (2500, IN), dtype=jnp.float32)
    y2 = jax.block_until_ready(linear_forward(x2, weight, tile_b=1024))
    ref2 = jnp.sum(x2, axis=-1, keepdims=True)
    assert y2.shape == (2500, OUT)
    assert jnp.allclose(y2, ref2, atol=1e-5, rtol=1e-5)

    # 3) bf16 input passthrough (HBM-traffic halving path); f32 accumulate.
    x3 = x.astype(jnp.bfloat16)
    y3 = jax.block_until_ready(linear_forward(x3, weight))
    ref3 = jnp.sum(x3.astype(jnp.float32), axis=-1, keepdims=True)
    assert y3.dtype == jnp.bfloat16
    assert jnp.allclose(y3.astype(jnp.float32), ref3, atol=5e-2, rtol=5e-2)

    # 4) Feature-major input path (skips the wrapper transpose copy).
    y4 = jax.block_until_ready(
        linear_forward(x.T, weight, x_is_feature_major=True))
    assert jnp.allclose(y4, ref, atol=1e-5, rtol=1e-5)

    print("KERNEL_OK")
</pallas_src>

<mosaic_0001>
module attributes {stable_mosaic.version = 11 : i64} {
  func.func @_linear_kernel(%arg0: i32, %arg1: memref<5xf32, #tpu.memory_space<smem>>, %arg2: memref<5x8x128xf32, #tpu.memory_space<vmem>>, %arg3: memref<8x128xf32, #tpu.memory_space<vmem>>) attributes {dimension_semantics = [#tpu.dimension_semantics<parallel>], iteration_bounds = array<i64: 1>, scalar_prefetch = 0 : i64, scratch_operands = 0 : i64, tpu.core_type = #tpu.core_type<tc>, window_params = [{transform_indices = @transform_0, window_bounds = array<i64: 5>}, {transform_indices = @transform_1, window_bounds = array<i64: 5, 8, 128>}, {transform_indices = @transform_2, window_bounds = array<i64: 8, 128>}]} {
    %c0 = arith.constant 0 : index
    %c0_0 = arith.constant 0 : index
    %c0_1 = arith.constant 0 : index
    %0 = vector.load %arg2[%c0, %c0_0, %c0_1] : memref<5x8x128xf32, #tpu.memory_space<vmem>>, vector<1x8x128xf32>
    %1 = vector.shape_cast %0 : vector<1x8x128xf32> to vector<8x128xf32>
    %c0_2 = arith.constant 0 : index
    %2 = memref.load %arg1[%c0_2] : memref<5xf32, #tpu.memory_space<smem>>
    %3 = vector.broadcast %2 : f32 to vector<8x128xf32>
    %4 = arith.mulf %1, %3 : vector<8x128xf32>
    %c1 = arith.constant 1 : index
    %c0_3 = arith.constant 0 : index
    %c0_4 = arith.constant 0 : index
    %5 = vector.load %arg2[%c1, %c0_3, %c0_4] : memref<5x8x128xf32, #tpu.memory_space<vmem>>, vector<1x8x128xf32>
    %6 = vector.shape_cast %5 : vector<1x8x128xf32> to vector<8x128xf32>
    %c1_5 = arith.constant 1 : index
    %7 = memref.load %arg1[%c1_5] : memref<5xf32, #tpu.memory_space<smem>>
    %8 = vector.broadcast %7 : f32 to vector<8x128xf32>
    %9 = arith.mulf %6, %8 : vector<8x128xf32>
    %10 = arith.addf %4, %9 : vector<8x128xf32>
    %c2 = arith.constant 2 : index
    %c0_6 = arith.constant 0 : index
    %c0_7 = arith.constant 0 : index
    %11 = vector.load %arg2[%c2, %c0_6, %c0_7] : memref<5x8x128xf32, #tpu.memory_space<vmem>>, vector<1x8x128xf32>
    %12 = vector.shape_cast %11 : vector<1x8x128xf32> to vector<8x128xf32>
    %c2_8 = arith.constant 2 : index
    %13 = memref.load %arg1[%c2_8] : memref<5xf32, #tpu.memory_space<smem>>
    %14 = vector.broadcast %13 : f32 to vector<8x128xf32>
    %15 = arith.mulf %12, %14 : vector<8x128xf32>
    %16 = arith.addf %10, %15 : vector<8x128xf32>
    %c3 = arith.constant 3 : index
    %c0_9 = arith.constant 0 : index
    %c0_10 = arith.constant 0 : index
    %17 = vector.load %arg2[%c3, %c0_9, %c0_10] : memref<5x8x128xf32, #tpu.memory_space<vmem>>, vector<1x8x128xf32>
    %18 = vector.shape_cast %17 : vector<1x8x128xf32> to vector<8x128xf32>
    %c3_11 = arith.constant 3 : index
    %19 = memref.load %arg1[%c3_11] : memref<5xf32, #tpu.memory_space<smem>>
    %20 = vector.broadcast %19 : f32 to vector<8x128xf32>
    %21 = arith.mulf %18, %20 : vector<8x128xf32>
    %22 = arith.addf %16, %21 : vector<8x128xf32>
    %c4 = arith.constant 4 : index
    %c0_12 = arith.constant 0 : index
    %c0_13 = arith.constant 0 : index
    %23 = vector.load %arg2[%c4, %c0_12, %c0_13] : memref<5x8x128xf32, #tpu.memory_space<vmem>>, vector<1x8x128xf32>
    %24 = vector.shape_cast %23 : vector<1x8x128xf32> to vector<8x128xf32>
    %c4_14 = arith.constant 4 : index
    %25 = memref.load %arg1[%c4_14] : memref<5xf32, #tpu.memory_space<smem>>
    %26 = vector.broadcast %25 : f32 to vector<8x128xf32>
    %27 = arith.mulf %24, %26 : vector<8x128xf32>
    %28 = arith.addf %22, %27 : vector<8x128xf32>
    %c0_15 = arith.constant 0 : index
    %c0_16 = arith.constant 0 : index
    %29 = vector.load %arg3[%c0_15, %c0_16] : memref<8x128xf32, #tpu.memory_space<vmem>>, vector<8x128xf32>
    tpu.vector_store %arg3[%c0_15, %c0_16], %28 {strides = array<i32>} : memref<8x128xf32, #tpu.memory_space<vmem>>, vector<8x128xf32>,
    return
  }
  func.func @transform_0(%arg0: i32) -> i32 {
    %c0_i32 = arith.constant 0 : i32
    %c0_i32_0 = arith.constant 0 : i32
    return %c0_i32 : i32
  }
  func.func @transform_1(%arg0: i32) -> (i32, i32, i32) {
    %c0_i32 = arith.constant 0 : i32
    %c0_i32_0 = arith.constant 0 : i32
    %c0_i32_1 = arith.constant 0 : i32
    return %c0_i32, %arg0, %c0_i32_0 : i32, i32, i32
  }
  func.func @transform_2(%arg0: i32) -> (i32, i32) {
    %c0_i32 = arith.constant 0 : i32
    %c0_i32_0 = arith.constant 0 : i32
    return %arg0, %c0_i32 : i32, i32
  }
}

</mosaic_0001>

<bundles_post_ra>
// kernel: tpu_custom_call.1
= control target key start
LH: loop header
LB: loop body
LE: loop exit
PB: predicated region body
PF: predicated region fallthrough
CT: control target
= control target key end

     0   :  { %7 = vsyncpa [#allocation5], 0  ;;  %s192_s0 = inlined_call_operand.hbm [shape: f32[5], index: 0, kind: input, shape index: {}]   ;;  %s193_s1 = inlined_call_operand.hbm [shape: f32[5,8,128], index: 1, kind: input, shape index: {}]   ;;  %s194_s2 = inlined_call_operand.hbm [shape: f32[8,128], index: 2, kind: output, shape index: {}]  }
   0x1   :  { %8 = vsyncpa [#allocation3], 0 }
   0x2   :  { %9 = vsyncpa [#allocation4], 0  ;;  %s15_s11 = sshll.u32 %s192_s0, 4  ;;  %s23_s14 = sshll.u32 %s193_s1, 4  ;;  %s16_s11 = int_to_ptr.hbm [resolvable:$true] %s15_s11  ;;  %s24_s14 = int_to_ptr.hbm [resolvable:$true] %s23_s14 }
   0x3   :  { %s163_s15 = smov [#allocation2]   ;;  %s164_s16 = smov [#allocation6]  }
   0x4   :  { %18 = dma.hbm_to_smem %s16_s11, 16, %s163_s15, [#allocation5]  }
   0x5   :  { %s25_s17 = sshll.u32 %s164_s16, 4  ;;  %s165_s18 = smov 128   ;;  %s26_s17 = int_to_ptr.vmem [resolvable:$true] %s25_s17 }
   0x6   :  { %s166_s19 = smov 8  }
   0x7   :  { %31 = dma.hbm_to_vmem [thread:$0]  %s24_s14, 640, %s26_s17, [#allocation3], %s165_s18, %s165_s18, %s166_s19  }
   0x8   :  { %157 = dma.done.wait [#allocation5], 16  }
   0x9   :  { %158 = vsyncadd [#allocation5], 4294967280 }
   0xa   :  { %159 = dma.done.wait [#allocation3], 640  }
   0xb   :  { %160 = vsyncadd [#allocation3], 4294966656 }
   0xc   :  { %40 = sfence }
   0xd   :  { %s42_s0 = sld [smem:[#allocation2]]  ;;  %v41_v0 = vld [vmem:[#allocation6] sm:$0xff]  ;;  %v46_v1 = vld [vmem:[#allocation6 + $0x8] sm:$0xff]  ;;  %v52_v3 = vld [vmem:[#allocation6 + $0x10] sm:$0xff]  ;;  %s167_s23 = smov [#allocation7]  }
   0xe   :  { %s88_s20 = sld [smem:[#allocation2 + $0x1]]  ;;  %v58_v6 = vld [vmem:[#allocation6 + $0x18] sm:$0xff]  ;;  %v64_v11 = vld [vmem:[#allocation6 + $0x20] sm:$0xff]  ;;  %s75_s24 = sshll.u32 %s167_s23, 4  ;;  %s76_s24 = int_to_ptr.vmem [resolvable:$true] %s75_s24 }
   0xf   :  { %s89_s21 = sld [smem:[#allocation2 + $0x2]]  ;;  %s77_s27 = sshll.u32 %s194_s2, 4  ;;  %s78_s27 = int_to_ptr.hbm [resolvable:$true] %s77_s27 }
  0x10   :  { %s90_s22 = sld [smem:[#allocation2 + $0x3]] }
  0x11   :  { %s91_s1 = sld [smem:[#allocation2 + $0x4]] }
  0x13   :  { %v43_v2 = vstv %s42_s0 }
  0x14   :  { %v44_v4 = vmul.f32 %v43_v2, %v41_v0  ;;  %v48_v5 = vstv %s88_s20 }
  0x15   :  { %v49_v7 = vmul.f32 %v48_v5, %v46_v1  ;;  %v54_v8 = vstv %s89_s21 }
  0x16   :  { %v55_v9 = vmul.f32 %v54_v8, %v52_v3  ;;  %v60_v10 = vstv %s90_s22 }
  0x17   :  { %v50_v12 = vadd.f32 %v49_v7, %v44_v4  ;;  %v61_v13 = vmul.f32 %v60_v10, %v58_v6  ;;  %v66_v14 = vstv %s91_s1 }
  0x18   :  { %v67_v16 = vmul.f32 %v66_v14, %v64_v11 }
  0x19   :  { %v56_v15 = vadd.f32 %v55_v9, %v50_v12 }
  0x1b   :  { %v62_v17 = vadd.f32 %v61_v13, %v56_v15 }
  0x1d   :  { %v68_v18 = vadd.f32 %v67_v16, %v62_v17 }
  0x1f   :  { %69 = vst [vmem:[#allocation7] sm:$0xff] %v68_v18 }
  0x20   :  { %80 = dma.vmem_to_hbm [thread:$0]  %s76_s24, 128, %s78_s27, [#allocation4]  }
  0x21   :  { %161 = dma.done.wait [#allocation4], 128  }
  0x22   :  { %162 = vsyncadd [#allocation4], 4294967168 }
  0x23   :  { %85 = vsyncpa [#allocation3], 1 }
  0x24   :  { %86 = vsyncpa [#allocation4], 1 }
  0x25   :  { %87 = vsyncpa [#allocation5], 1 }

</bundles_post_ra>
